<compile_context>
chip_gen: v6e
topology: v6e:2x2x1
jax: 0.10.0
libtpu: 0.0.40
codegen_flags: <defaults>
</compile_context>

<pallas_src>
import functools

import jax
import jax.numpy as jnp
from jax.experimental import pallas as pl
from jax.experimental.pallas import tpu as pltpu


def fused_conv_bn_relu_kernel(w_ref, p_ref, gb_ref, o_ref, *, eps):
    """Single-matmul conv + train-mode BatchNorm + ReLU, channel-major.

    w_ref : (Osub, Kpad)  weights, K = KH*KW*C (zero-padded)
    p_ref : (Kpad, M)     im2col patches, M = N*OH*OW
    gb_ref: (Osub, 2)     column 0 = gamma, column 1 = beta
    o_ref : (Osub, M)     ReLU(BN(conv(x))) output, channel-major
    """
    # Convolution as one MXU matmul; K-accumulation stays inside the MXU.
    y = jnp.dot(w_ref[...], p_ref[...], preferred_element_type=jnp.float32)

    # Training-mode BatchNorm2d statistics: per-channel (row) stats over all
    # N*OH*OW positions (lanes).  Two-pass biased variance matches PyTorch's
    # normalization statistics.
    mean = jnp.mean(y, axis=1, keepdims=True)                   # (Osub, 1)
    centered = y - mean
    var = jnp.mean(centered * centered, axis=1, keepdims=True)  # (Osub, 1)
    scale = gb_ref[:, 0:1] * jax.lax.rsqrt(var + eps)           # gamma/sqrt(var+eps)
    shift = gb_ref[:, 1:2] - mean * scale                       # beta - mean*scale

    # Folded affine + ReLU; (Osub, M) store is lane-dense in M.
    o_ref[...] = jnp.maximum(y * scale + shift, 0.0)


def conv_block_forward(x_nchw, w_oihw, bias_o, gamma, beta, *, padding=1, eps=1e-5):
    """Forward of ConvBlock: ReLU(BatchNorm2d(Conv2d(x))) with batch statistics."""
    del bias_o  # Train-mode BN subtracts the batch mean -> conv bias cancels exactly.
    N, C, H, W = x_nchw.shape
    O, _, KH, KW = w_oihw.shape
    OH = H + 2 * padding - KH + 1
    OW = W + 2 * padding - KW + 1
    M = N * OH * OW
    K = KH * KW * C
    Kpad = pl.cdiv(K, 8) * 8          # sublane-align the contraction dim
    Osub = pl.cdiv(O, 8) * 8          # sublane-align the channel dim

    # --- glue: NHWC zero-padded input, then im2col patch matrix (K, M) -------
    x_nhwc = jnp.transpose(x_nchw, (0, 2, 3, 1)).astype(jnp.float32)
    xp = jnp.pad(x_nhwc, ((0, 0), (padding, padding), (padding, padding), (0, 0)))
    slabs = [xp[:, kh:kh + OH, kw:kw + OW, :]            # (N, OH, OW, C) per tap
             for kh in range(KH) for kw in range(KW)]
    patches = jnp.stack(slabs, axis=0)                   # (KH*KW, N, OH, OW, C)
    patches = jnp.transpose(patches, (0, 4, 1, 2, 3))    # (KH*KW, C, N, OH, OW)
    patches = patches.reshape(K, M)
    patches = jnp.pad(patches, ((0, Kpad - K), (0, 0)))  # (Kpad, M)

    # --- glue: weights (O, C, KH, KW) -> (Osub, Kpad), same (kh, kw, c) order ---
    # TODO(synk): at production channel counts cast x/w to bfloat16 for the MXU
    # (keep f32 accumulation and f32 BN/elementwise math); f32 kept here to hold
    # the 1e-4 reference check at this toy size.
    w_mat = jnp.transpose(w_oihw, (0, 2, 3, 1)).reshape(O, K).astype(jnp.float32)
    w_mat = jnp.pad(w_mat, ((0, Osub - O), (0, Kpad - K)))

    # --- glue: pack gamma/beta into one (Osub, 2) operand (single tiny DMA) ---
    g_col = jnp.pad(gamma.astype(jnp.float32), (0, Osub - O), constant_values=1.0)
    b_col = jnp.pad(beta.astype(jnp.float32), (0, Osub - O))
    gb = jnp.stack([g_col, b_col], axis=1)               # (Osub, 2)

    kernel = functools.partial(fused_conv_bn_relu_kernel, eps=eps)

    # Whole problem (~100 KB) is VMEM-resident in a single grid step on
    # v5e/v6e/v7x, so run one shot with everything in VMEM.
    # TODO(synk): for large N*OH*OW, tile M over a "parallel" grid axis (both
    # v7x TensorCores) with per-tile partial BN sums combined in a tiny second
    # pass, and cap the tile so double-buffered patches + resident y fit v7x's
    # 64 MiB VMEM (set vmem_limit_bytes explicitly).
    out_t = pl.pallas_call(
        kernel,
        out_shape=jax.ShapeDtypeStruct((Osub, M), jnp.float32),
        grid=(1,),
        in_specs=[pl.BlockSpec((Osub, Kpad), lambda i: (0, 0)),
                  pl.BlockSpec((Kpad, M), lambda i: (0, 0)),
                  pl.BlockSpec((Osub, 2), lambda i: (0, 0))],
        out_specs=pl.BlockSpec((Osub, M), lambda i: (0, 0)),
        compiler_params=pltpu.CompilerParams(
            dimension_semantics=("arbitrary",)),
    )(w_mat, patches, gb)

    # TODO(synk): running_mean/running_var buffer updates are module state, not
    # part of the forward output, so they are not materialized here.

    out = out_t[:O].reshape(O, N, OH, OW)                # channel-major -> NCHW
    return jnp.transpose(out, (1, 0, 2, 3))


def conv_block_reference(x, w, b, gamma, beta, *, padding=1, eps=1e-5):
    """Pure-JAX reference matching PyTorch ConvBlock forward (train-mode BN)."""
    y = jax.lax.conv_general_dilated(
        x, w, window_strides=(1, 1),
        padding=[(padding, padding), (padding, padding)],
        dimension_numbers=("NCHW", "OIHW", "NCHW"))
    y = y + b.reshape(1, -1, 1, 1)
    mean = y.mean(axis=(0, 2, 3), keepdims=True)
    var = y.var(axis=(0, 2, 3), keepdims=True)  # biased, as PyTorch normalizes with
    yn = (y - mean) / jnp.sqrt(var + eps)
    yn = yn * gamma.reshape(1, -1, 1, 1) + beta.reshape(1, -1, 1, 1)
    return jnp.maximum(yn, 0.0)


if __name__ == "__main__":
    # Module config: ConvBlock(in_channels=4, out_channels=8, kernel_size=3, padding=1)
    N, C, H, W = 2, 4, 16, 16
    O, KH, KW, P = 8, 3, 3, 1

    key = jax.random.PRNGKey(0)
    kx, kw_, kb, kg, kbe = jax.random.split(key, 5)
    x = jax.random.normal(kx, (N, C, H, W), dtype=jnp.float32)
    w = 0.1 * jax.random.normal(kw_, (O, C, KH, KW), dtype=jnp.float32)
    b = 0.1 * jax.random.normal(kb, (O,), dtype=jnp.float32)
    gamma = 1.0 + 0.1 * jax.random.normal(kg, (O,), dtype=jnp.float32)
    beta = 0.1 * jax.random.normal(kbe, (O,), dtype=jnp.float32)

    out = conv_block_forward(x, w, b, gamma, beta, padding=P)
    out = jax.block_until_ready(out)

    ref = conv_block_reference(x, w, b, gamma, beta, padding=P)
    assert out.shape == (N, O, H, W)
    assert jnp.allclose(out, ref, rtol=1e-4, atol=1e-4), "mismatch vs reference"

    print("KERNEL_OK")
</pallas_src>

<mosaic_0001>
module attributes {stable_mosaic.version = 11 : i64} {
  func.func @fused_conv_bn_relu_kernel(%arg0: i32, %arg1: memref<8x40xf32, #tpu.memory_space<vmem>>, %arg2: memref<40x512xf32, #tpu.memory_space<vmem>>, %arg3: memref<8x2xf32, #tpu.memory_space<vmem>>, %arg4: memref<8x512xf32, #tpu.memory_space<vmem>>) attributes {dimension_semantics = [#tpu.dimension_semantics<arbitrary>], iteration_bounds = array<i64: 1>, scalar_prefetch = 0 : i64, scratch_operands = 0 : i64, tpu.core_type = #tpu.core_type<tc>, window_params = [{pipeline_mode = #tpu.pipeline_mode<synchronous>, transform_indices = @transform_0, window_bounds = array<i64: 8, 40>}, {pipeline_mode = #tpu.pipeline_mode<synchronous>, transform_indices = @transform_1, window_bounds = array<i64: 40, 512>}, {pipeline_mode = #tpu.pipeline_mode<synchronous>, transform_indices = @transform_2, window_bounds = array<i64: 8, 2>}, {pipeline_mode = #tpu.pipeline_mode<synchronous>, transform_indices = @transform_3, window_bounds = array<i64: 8, 512>}]} {
    %c0 = arith.constant 0 : index
    %c0_0 = arith.constant 0 : index
    %0 = vector.load %arg1[%c0, %c0_0] : memref<8x40xf32, #tpu.memory_space<vmem>>, vector<8x40xf32>
    %c0_1 = arith.constant 0 : index
    %c0_2 = arith.constant 0 : index
    %1 = vector.load %arg2[%c0_1, %c0_2] : memref<40x512xf32, #tpu.memory_space<vmem>>, vector<40x512xf32>
    %cst = arith.constant dense<0.000000e+00> : vector<8x512xf32>
    %2 = tpu.matmul %0, %1, %cst {dimension_numbers = #tpu.dot_dimension_numbers<[1], [0], [0], [1], [0, 0, 1, 1], [], []>} : vector<8x40xf32>, vector<40x512xf32>, vector<8x512xf32> -> vector<8x512xf32>
    %cst_3 = arith.constant dense<0.000000e+00> : vector<8xf32>
    %3 = vector.multi_reduction <add>, %2, %cst_3 [1] : vector<8x512xf32> to vector<8xf32>
    %4 = vector.shape_cast %3 : vector<8xf32> to vector<8x1xf32>
    %cst_4 = arith.constant 5.120000e+02 : f32
    %5 = vector.broadcast %cst_4 : f32 to vector<8x1xf32>
    %6 = arith.divf %4, %5 : vector<8x1xf32>
    %7 = vector.broadcast %6 : vector<8x1xf32> to vector<8x512xf32>
    %8 = arith.subf %2, %7 : vector<8x512xf32>
    %9 = arith.mulf %8, %8 : vector<8x512xf32>
    %cst_5 = arith.constant dense<0.000000e+00> : vector<8xf32>
    %10 = vector.multi_reduction <add>, %9, %cst_5 [1] : vector<8x512xf32> to vector<8xf32>
    %11 = vector.shape_cast %10 : vector<8xf32> to vector<8x1xf32>
    %cst_6 = arith.constant 5.120000e+02 : f32
    %12 = vector.broadcast %cst_6 : f32 to vector<8x1xf32>
    %13 = arith.divf %11, %12 : vector<8x1xf32>
    %c0_7 = arith.constant 0 : index
    %c0_8 = arith.constant 0 : index
    %14 = vector.load %arg3[%c0_7, %c0_8] : memref<8x2xf32, #tpu.memory_space<vmem>>, vector<8x1xf32>
    %cst_9 = arith.constant 9.99999974E-6 : f32
    %15 = vector.broadcast %cst_9 : f32 to vector<8x1xf32>
    %16 = arith.addf %13, %15 : vector<8x1xf32>
    %17 = math.rsqrt %16 : vector<8x1xf32>
    %18 = arith.mulf %14, %17 : vector<8x1xf32>
    %c0_10 = arith.constant 0 : index
    %c1 = arith.constant 1 : index
    %19 = vector.load %arg3[%c0_10, %c1] : memref<8x2xf32, #tpu.memory_space<vmem>>, vector<8x1xf32>
    %20 = arith.mulf %6, %18 : vector<8x1xf32>
    %21 = arith.subf %19, %20 : vector<8x1xf32>
    %22 = vector.broadcast %18 : vector<8x1xf32> to vector<8x512xf32>
    %23 = arith.mulf %2, %22 : vector<8x512xf32>
    %24 = vector.broadcast %21 : vector<8x1xf32> to vector<8x512xf32>
    %25 = arith.addf %23, %24 : vector<8x512xf32>
    %cst_11 = arith.constant 0.000000e+00 : f32
    %26 = vector.broadcast %cst_11 : f32 to vector<8x512xf32>
    %27 = arith.maximumf %25, %26 : vector<8x512xf32>
    %c0_12 = arith.constant 0 : index
    %c0_13 = arith.constant 0 : index
    %28 = vector.load %arg4[%c0_12, %c0_13] : memref<8x512xf32, #tpu.memory_space<vmem>>, vector<8x512xf32>
    tpu.vector_store %arg4[%c0_12, %c0_13], %27 {strides = array<i32>} : memref<8x512xf32, #tpu.memory_space<vmem>>, vector<8x512xf32>,
    return
  }
  func.func @transform_0(%arg0: i32) -> (i32, i32) {
    %c0_i32 = arith.constant 0 : i32
    %c0_i32_0 = arith.constant 0 : i32
    %c0_i32_1 = arith.constant 0 : i32
    return %c0_i32, %c0_i32_0 : i32, i32
  }
  func.func @transform_1(%arg0: i32) -> (i32, i32) {
    %c0_i32 = arith.constant 0 : i32
    %c0_i32_0 = arith.constant 0 : i32
    %c0_i32_1 = arith.constant 0 : i32
    return %c0_i32, %c0_i32_0 : i32, i32
  }
  func.func @transform_2(%arg0: i32) -> (i32, i32) {
    %c0_i32 = arith.constant 0 : i32
    %c0_i32_0 = arith.constant 0 : i32
    %c0_i32_1 = arith.constant 0 : i32
    return %c0_i32, %c0_i32_0 : i32, i32
  }
  func.func @transform_3(%arg0: i32) -> (i32, i32) {
    %c0_i32 = arith.constant 0 : i32
    %c0_i32_0 = arith.constant 0 : i32
    %c0_i32_1 = arith.constant 0 : i32
    return %c0_i32, %c0_i32_0 : i32, i32
  }
}

</mosaic_0001>

<bundles_post_ra>
// kernel: tpu_custom_call.1
= control target key start
LH: loop header
LB: loop body
LE: loop exit
PB: predicated region body
PF: predicated region fallthrough
CT: control target
= control target key end

     0   :  { %8 = vsyncpa [#allocation3], 0  ;;  %s366_s0 = inlined_call_operand.vmem [shape: f32[8,40], index: 0, kind: input, shape index: {}]   ;;  %s367_s1 = inlined_call_operand.hbm [shape: f32[40,512], index: 1, kind: input, shape index: {}]   ;;  %s368_s2 = inlined_call_operand.vmem [shape: f32[8,2], index: 2, kind: input, shape index: {}]   ;;  %s369_s3 = inlined_call_operand.hbm [shape: f32[8,512], index: 3, kind: output, shape index: {}]  }
   0x1   :  { %9 = vsyncpa [#allocation4], 0  ;;  %s326_s12 = smov [#allocation2]  }
   0x2   :  { %s17_s13 = sshll.u32 %s326_s12, 4  ;;  %s18_s13 = int_to_ptr.vmem [resolvable:$true] %s17_s13 }
   0x3   :  { %s290_s14 = scalar_lea.vmem %s18_s13, 2560  ;;  %p295_p1 = scmp.lt.s32.totalorder %s18_s13, %s18_s13 }
   0x4   :  { %p291_p0 = scmp.ne.s32.totalorder %s18_s13, %s290_s14  ;;  %p296_p2 = scmp.lt.s32.totalorder %s290_s14, %s290_s14 }
   0x6   :  { %p297_p3 = por %p296_p2, %p295_p1 }
   0x8   :  { %p298_p4 = pnand %p297_p3, %p291_p0 }
   0xa   :  { %301 = shalt.err (!%p298_p4)
}
   0xb   :  { %s327_s15 = smov 512   ;;  %s328_s16 = smov 32  }
   0xc   :  { %23 = dma.hbm_to_vmem [thread:$0]  %s367_s1, 2560, %s18_s13, [#allocation3], %s327_s15, %s327_s15, %s328_s16  }
   0xd   :  { %322 = dma.done.wait [#allocation3], 2560  }
   0xe   :  { %323 = vsyncadd [#allocation3], 4294964736  ;;  %v329_v0 = vmov 0.0   ;;  %v47_v1 = vld [vmem:[#allocation2 + $0x88] sm:$0xff]  ;;  %v46_v2 = vld [vmem:[#allocation2 + $0x80] sm:$0xff]  ;;  %vm50_vm0 = vcmask 326656  }
   0xf   :  { %118 = vmatprep.mubr.f32.mxu0 %v329_v0  ;;  %189 = vmatprep.mubr.f32.mxu1 %v329_v0  ;;  %v43_v3 = vld [vmem:[#allocation2 + $0x68] sm:$0xff]  ;;  %v49_v4 = vld [vmem:[#allocation2 + $0x98] sm:$0xff]  ;;  %v42_v5 = vld [vmem:[#allocation2 + $0x60] sm:$0xff]  ;;  %v330_v42 = vmov 0   ;;  %v331_v46 = vmov 1   ;;  %s332_s21 = smov 1  }
  0x10   :  { %76 = vmatprep.subr.mxu0 %v47_v1  ;;  %v48_v6 = vld [vmem:[#allocation2 + $0x90] sm:$0xff]  ;;  %147 = vmatprep.subr.mxu1 %v49_v4  ;;  %v39_v7 = vld [vmem:[#allocation2 + $0x48] sm:$0xff]  ;;  %v45_v8 = vld [vmem:[#allocation2 + $0x78] sm:$0xff]  ;;  %s333_s22 = smov [#allocation5]  }
  0x11   :  { %77 = vmatpush1.msra.mxu0 %v46_v2  ;;  %148 = vmatpush1.msra.mxu1 %v48_v6  ;;  %v38_v9 = vld [vmem:[#allocation2 + $0x40] sm:$0xff]  ;;  %v44_v10 = vld [vmem:[#allocation2 + $0x70] sm:$0xff]  ;;  %v41_v11 = vld [vmem:[#allocation2 + $0x58] sm:$0xff]  ;;  %s259_s23 = sshll.u32 %s333_s22, 4  ;;  %s260_s23 = int_to_ptr.vmem [resolvable:$true] %s259_s23 }
  0x12   :  { %78 = vmatprep.subr.mxu0 %v43_v3  ;;  %149 = vmatprep.subr.mxu1 %v45_v8  ;;  %v35_v12 = vld [vmem:[#allocation2 + $0x28] sm:$0xff]  ;;  %v40_v13 = vld [vmem:[#allocation2 + $0x50] sm:$0xff]  ;;  %v34_v14 = vld [vmem:[#allocation2 + $0x20] sm:$0xff]  ;;  %p307_p6 = scmp.lt.s32.totalorder %s260_s23, %s260_s23 }
  0x13   :  { %79 = vmatpush1.msra.mxu0 %v42_v5  ;;  %150 = vmatpush1.msra.mxu1 %v44_v10  ;;  %v37_v15 = vld [vmem:[#allocation2 + $0x38] sm:$0xff]  ;;  %v31_v16 = vld [vmem:[#allocation2 + $0x8] sm:$0xff]  ;;  %v36_v17 = vld [vmem:[#allocation2 + $0x30] sm:$0xff] }
  0x14   :  { %80 = vmatprep.subr.mxu0 %v39_v7  ;;  %151 = vmatprep.subr.mxu1 %v41_v11  ;;  %v30_v18 = vld [vmem:[#allocation2] sm:$0xff]  ;;  %v33_v19 = vld [vmem:[#allocation2 + $0x18] sm:$0xff]  ;;  %v32_v21 = vld [vmem:[#allocation2 + $0x10] sm:$0xff] }
  0x15   :  { %81 = vmatpush1.msra.mxu0 %v38_v9  ;;  %152 = vmatpush1.msra.mxu1 %v40_v13  ;;  %v29_v20 = vld [vmem:[%s366_s0] sm:$0xff] }
  0x16   :  { %82 = vmatprep.subr.mxu0 %v35_v12  ;;  %153 = vmatprep.subr.mxu1 %v37_v15  ;;  %v217_v47 = vld [vmem:[%s368_s2] sm:$0xff]  ;;  %s302_s2 = scalar_lea.vmem %s260_s23, 512 }
  0x17   :  { %83 = vmatpush1.msra.mxu0 %v34_v14  ;;  %154 = vmatpush1.msra.mxu1 %v36_v17  ;;  %p303_p5 = scmp.ne.s32.totalorder %s260_s23, %s302_s2  ;;  %p308_p7 = scmp.lt.s32.totalorder %s302_s2, %s302_s2 }
  0x18   :  { %84 = vmatprep.subr.mxu0 %v31_v16  ;;  %155 = vmatprep.subr.mxu1 %v33_v19 }
  0x19   :  { %85 = vmatpush1.msra.mxu0 %v30_v18  ;;  %156 = vmatpush1.msra.mxu1 %v32_v21  ;;  %p309_p8 = por %p308_p7, %p307_p6 }
  0x1a   :  { %268 = vmatmul.mubr.msk.f32.vlgmr.msra.gmra.mxu0 %vm50_vm0, %v29_v20  ;;  %269 = vmatmul.mubr.msk.f32.vlgmr.msra.gmra.mxu1 %vm50_vm0, %v29_v20 }
  0x1b   :  { %278 = vset.pattern.permute.xlu1 %v330_v42  ;;  %279 = vset.pattern.permute.xlu0 %v331_v46  ;;  %p310_p9 = pnand %p309_p8, %p303_p5 }
  0xda   :  { %v120_v22 = vpop.f32.mrf.mxu0  ;;  %v191_v24 = vpop.f32.mrf.mxu1 }
  0xdc   :  { %v122_v23 = vpop.f32.mrf.mxu0  ;;  %v193_v27 = vpop.f32.mrf.mxu1 }
  0xdd   :  { %v196_v25 = vadd.f32 %v122_v23, %v120_v22 }
  0xdf   :  { %v197_v26 = vadd.f32 %v196_v25, %v191_v24 }
  0xe1   :  { %v198_v28 = vadd.f32 %v197_v26, %v193_v27 }
  0xe3   :  { %199 = vadd.xlane.f32.xlu0 %v198_v28 }
 0x16c   :  { %v200_v29 = vpop.xlane.xlu0 %199 }
 0x16d   :  { %v202_v30 = vmul.f32 0.001953125, %v200_v29 }
 0x16f   :  { %v203_v31 = vsub.f32 %v120_v22, %v202_v30  ;;  %v204_v32 = vsub.f32 %v122_v23, %v202_v30  ;;  %v205_v33 = vsub.f32 %v191_v24, %v202_v30  ;;  %v206_v34 = vsub.f32 %v193_v27, %v202_v30 }
 0x171   :  { %v207_v35 = vmul.f32 %v203_v31, %v203_v31  ;;  %v208_v36 = vmul.f32 %v204_v32, %v204_v32  ;;  %v209_v37 = vmul.f32 %v205_v33, %v205_v33  ;;  %v210_v39 = vmul.f32 %v206_v34, %v206_v34 }
 0x173   :  { %v211_v38 = vadd.f32 %v208_v36, %v207_v35 }
 0x175   :  { %v212_v40 = vadd.f32 %v211_v38, %v209_v37 }
 0x177   :  { %v213_v41 = vadd.f32 %v212_v40, %v210_v39 }
 0x179   :  { %214 = vadd.xlane.f32.xlu0 %v213_v41 }
 0x202   :  { %v215_v43 = vpop.xlane.xlu0 %214 }
 0x203   :  { %v216_v44 = vmul.f32 0.001953125, %v215_v43 }
 0x205   :  { %v218_v45 = vadd.f32 1e-05, %v216_v44 }
 0x207   :  { %280 = vrsqrt.f32 %v218_v45 }
 0x214   :  { %v281_v48 = vpop.eup %280 }
 0x215   :  { %v220_v49 = vmul.f32 %v281_v48, %v217_v47 }
 0x217   :  { %v221_v50 = vmul.f32 %v220_v49, %v202_v30 }
 0x219   :  { %223 = vrot.lane.b32.xlu1 %v221_v50, %s332_s21 }
 0x21d   :  { %229 = vperm.xlu1 %278, %v220_v49  }
 0x28b   :  { %v224_v51 = vpop.permute.xlu1 %223 }
 0x28c   :  { %v226_v52 = vsub.f32 %v217_v47, %v224_v51 }
 0x28e   :  { %238 = vperm.xlu0 %279, %v226_v52  }
 0x298   :  { %v230_v53 = vpop.permute.xlu1 %229 }
 0x299   :  { %v232_v54 = vmul.f32 %v230_v53, %v120_v22  ;;  %v233_v55 = vmul.f32 %v230_v53, %v122_v23  ;;  %v234_v56 = vmul.f32 %v230_v53, %v191_v24  ;;  %v235_v57 = vmul.f32 %v230_v53, %v193_v27 }
 0x309   :  { %v239_v58 = vpop.permute.xlu0 %238 }
 0x30a   :  { %v241_v59 = vadd.f32 %v239_v58, %v232_v54  ;;  %v242_v60 = vadd.f32 %v239_v58, %v233_v55  ;;  %v243_v61 = vadd.f32 %v239_v58, %v234_v56  ;;  %v244_v62 = vadd.f32 %v239_v58, %v235_v57 }
 0x30c   :  { %v245_v63 = vmax.f32 %v241_v59, 0.0  ;;  %v246_v0 = vmax.f32 %v242_v60, 0.0  ;;  %v247_v1 = vmax.f32 %v243_v61, 0.0  ;;  %v248_v2 = vmax.f32 %v244_v62, 0.0 }
 0x30e   :  { %249 = vst [vmem:[#allocation5] sm:$0xff] %v245_v63  ;;  %250 = vst [vmem:[#allocation5 + $0x8] sm:$0xff] %v246_v0 }
 0x30f   :  { %251 = vst [vmem:[#allocation5 + $0x10] sm:$0xff] %v247_v1  ;;  %252 = vst [vmem:[#allocation5 + $0x18] sm:$0xff] %v248_v2 }
 0x310   :  { %313 = shalt.err (!%p310_p9)
}
 0x311   :  { %262 = dma.vmem_to_hbm [thread:$0]  %s260_s23, 512, %s369_s3, [#allocation4]  }
 0x312   :  { %324 = dma.done.wait [#allocation4], 512  }
 0x313   :  { %325 = vsyncadd [#allocation4], 4294966784 }
 0x314   :  { %266 = vsyncpa [#allocation3], 1 }
 0x315   :  { %267 = vsyncpa [#allocation4], 1 }

</bundles_post_ra>
